<compile_context>
chip_gen: v6e
topology: v6e:2x2x1
jax: 0.10.0
libtpu: 0.0.40
codegen_flags: <defaults>
</compile_context>

<pallas_src>
import functools
import math

import numpy as np
import jax
import jax.numpy as jnp
from jax.experimental import pallas as pl
from jax.experimental.pallas import tpu as pltpu

LANE = 128  # pad colours to a lane-dense width


def _gcp_head_kernel(x_ref, w_ref, b_ref, out_ref):
    # x_ref : (TILE_M, H)   flattened (batch*node) feature rows for this tile
    # w_ref : (H, Cp)       folded head+decode weights (colours zero-padded to Cp)
    # b_ref : (1, Cp)       folded bias (f32; holds -inf in col 0 for non-logk)
    # out_ref: (TILE_M, Cp) per-row per-colour logits
    out = jnp.dot(x_ref[...], w_ref[...], preferred_element_type=jnp.float32) + b_ref[...]
    out_ref[...] = out.astype(out_ref.dtype)


def _round_up(v, m):
    return -(-v // m) * m


def gcp_bin_rrcn_pred(x, w, bias, chromatic_num, *, logk=True, return_lane_dense=False):
    """Inference forward of GCP_BIN_RRCN (pred only).

    Returns (bs, K+1, N, ts=1), or the raw lane-dense (bs, N, 128) kernel output
    if return_lane_dense=True.
    """
    bs, N, H = x.shape
    K = int(np.max(np.asarray(chromatic_num)))
    L = (math.floor(math.log2(K)) + 1) if logk else K
    C = K + 1
    Cp = LANE
    assert C <= Cp, "colour count exceeds lane padding"

    # ---- constant-fold the decode into the solver head (plain JAX/numpy, once) ----
    st = np.zeros((L, Cp), np.float32)
    extra_bias = np.zeros((Cp,), np.float32)
    if logk:
        # sign^T[l, c] = +1 if bit l of colour c is set else -1  (the torch.where mask),
        # divided by L to realize .mean(levels).
        for l in range(L):
            for c in range(C):
                st[l, c] = 1.0 if (c & (1 << l)) else -1.0
        st /= float(L)
    else:
        # non-logk: logits = cat([-inf, dig_scores], levels) -> shift level l to colour l+1
        for l in range(L):
            st[l, l + 1] = 1.0
        extra_bias[0] = -np.inf          # fold the float('-inf') colour-0 row into the bias
    st_j = jnp.asarray(st)               # (L, Cp)

    compute_dtype = x.dtype
    w_eff = (w.astype(jnp.float32) @ st_j).astype(compute_dtype)                    # (H, Cp)
    b_eff = (bias.astype(jnp.float32) @ st_j + jnp.asarray(extra_bias))[None, :]    # (1, Cp), f32

    # ---- flatten batch into the row axis and pick an MXU/DMA-friendly row tile ----
    M = bs * N
    x2 = x.reshape(M, H)
    if M >= 2048:
        tile_m = 512
    elif M >= 256:
        tile_m = 256                      # multiple of 128: fills v5e's 128-wide MXU exactly
    else:
        tile_m = _round_up(M, 8)          # tiny problem: one full (8-aligned) tile
    M_pad = _round_up(M, tile_m)
    if M_pad != M:
        x2 = jnp.pad(x2, ((0, M_pad - M), (0, 0)))
    grid_m = M_pad // tile_m

    out = pl.pallas_call(
        _gcp_head_kernel,
        out_shape=jax.ShapeDtypeStruct((M_pad, Cp), jnp.float32),
        grid_spec=pltpu.PrefetchScalarGridSpec(
            num_scalar_prefetch=0,
            grid=(grid_m,),
            in_specs=[
                pl.BlockSpec((tile_m, H), lambda i: (i, 0)),
                pl.BlockSpec((H, Cp), lambda i: (0, 0)),   # VMEM-resident across the grid
                pl.BlockSpec((1, Cp), lambda i: (0, 0)),
            ],
            out_specs=pl.BlockSpec((tile_m, Cp), lambda i: (i, 0)),
        ),
        compiler_params=pltpu.CompilerParams(dimension_semantics=("parallel",)),
    )(x2, w_eff, b_eff)                                     # (M_pad, Cp)

    out = out[:M].reshape(bs, N, Cp)
    if return_lane_dense:
        return out                                          # (bs, N, 128), cols [0, K] valid
    # glue: slice off colour padding, move to PyTorch pred layout (bs, K+1, N, ts=1)
    pred = jnp.transpose(out[:, :, :C], (0, 2, 1))[..., None]
    return pred


def reference_pred(x, w, bias, chromatic_num, *, logk=True):
    """Pure-JAX transcription of the PyTorch eval-path semantics (for verification)."""
    bs, N, H = x.shape
    K = int(np.max(np.asarray(chromatic_num)))
    L = (math.floor(math.log2(K)) + 1) if logk else K
    ts = 1
    # stand-in solver head -> bin_logits laid out level-major, i.e.
    # bin_logits.view(bs, L*N, ts).reshape(bs, L, N, ts)
    node_logits = jnp.einsum("bnh,hl->bnl", x.astype(jnp.float32), w.astype(jnp.float32))
    node_logits = node_logits + bias.astype(jnp.float32)                  # (bs, N, L)
    dig_scores = jnp.transpose(node_logits, (0, 2, 1))[..., None]         # (bs, L, N, 1)
    if logk:
        dig_rpt = jnp.broadcast_to(
            jnp.transpose(dig_scores, (1, 0, 2, 3))[None], (K + 1, L, bs, N, ts)
        )
        mask = (np.arange(K + 1)[:, None] & (2 ** np.arange(L))[None, :]) > 0
        mask_e = jnp.asarray(mask)[:, :, None, None, None]
        logits = jnp.where(mask_e, dig_rpt, -dig_rpt).mean(axis=1)        # (K+1, bs, N, ts)
        pred = jnp.transpose(logits, (1, 0, 2, 3))                        # (bs, K+1, N, ts)
    else:
        pred = jnp.concatenate(
            [jnp.full((bs, 1, N, ts), -jnp.inf, dig_scores.dtype), dig_scores], axis=1
        )
    return pred


if __name__ == "__main__":
    key = jax.random.PRNGKey(0)
    bs, N, H = 2, 16, 32                      # batch, max_num_nodes, hidden
    chromatic_num = jnp.array([3, 4], dtype=jnp.int32)
    num_nodes = jnp.array([12, 16], dtype=jnp.int32)   # (masks only used by the training loss)
    K = int(chromatic_num.max())

    # ---- logk path, f32 ----
    L = math.floor(math.log2(K)) + 1
    kx, kw, kb = jax.random.split(key, 3)
    x = jax.random.normal(kx, (bs, N, H), jnp.float32)
    w = 0.1 * jax.random.normal(kw, (H, L), jnp.float32)
    bias = 0.01 * jax.random.normal(kb, (L,), jnp.float32)

    pred = jax.block_until_ready(gcp_bin_rrcn_pred(x, w, bias, chromatic_num, logk=True))
    ref = reference_pred(x, w, bias, chromatic_num, logk=True)
    assert pred.shape == (bs, K + 1, N, 1), pred.shape
    np.testing.assert_allclose(np.asarray(pred), np.asarray(ref), rtol=1e-4, atol=1e-5)

    # ---- non-logk path, f32 (-inf colour-0 folded into the bias) ----
    L2 = K
    w2 = 0.1 * jax.random.normal(kw, (H, L2), jnp.float32)
    bias2 = 0.01 * jax.random.normal(kb, (L2,), jnp.float32)
    pred2 = jax.block_until_ready(gcp_bin_rrcn_pred(x, w2, bias2, chromatic_num, logk=False))
    ref2 = reference_pred(x, w2, bias2, chromatic_num, logk=False)
    np.testing.assert_allclose(np.asarray(pred2), np.asarray(ref2), rtol=1e-4, atol=1e-5)

    # ---- logk path, bf16 inputs (f32 MXU accumulation), looser tolerance ----
    pred_bf = jax.block_until_ready(
        gcp_bin_rrcn_pred(x.astype(jnp.bfloat16), w, bias, chromatic_num, logk=True)
    )
    np.testing.assert_allclose(
        np.asarray(pred_bf, dtype=np.float32), np.asarray(ref), rtol=5e-2, atol=5e-2
    )

    print("KERNEL_OK")
</pallas_src>

<mosaic_0001>
module attributes {stable_mosaic.version = 11 : i64} {
  func.func @_gcp_head_kernel(%arg0: i32, %arg1: memref<32x32xf32, #tpu.memory_space<vmem>>, %arg2: memref<32x128xf32, #tpu.memory_space<vmem>>, %arg3: memref<1x128xf32, #tpu.memory_space<vmem>>, %arg4: memref<32x128xf32, #tpu.memory_space<vmem>>) attributes {dimension_semantics = [#tpu.dimension_semantics<parallel>], iteration_bounds = array<i64: 1>, scalar_prefetch = 0 : i64, scratch_operands = 0 : i64, tpu.core_type = #tpu.core_type<tc>, window_params = [{transform_indices = @transform_0, window_bounds = array<i64: 32, 32>}, {pipeline_mode = #tpu.pipeline_mode<synchronous>, transform_indices = @transform_1, window_bounds = array<i64: 32, 128>}, {pipeline_mode = #tpu.pipeline_mode<synchronous>, transform_indices = @transform_2, window_bounds = array<i64: 1, 128>}, {transform_indices = @transform_3, window_bounds = array<i64: 32, 128>}]} {
    %c0 = arith.constant 0 : index
    %c0_0 = arith.constant 0 : index
    %0 = vector.load %arg1[%c0, %c0_0] : memref<32x32xf32, #tpu.memory_space<vmem>>, vector<32x32xf32>
    %c0_1 = arith.constant 0 : index
    %c0_2 = arith.constant 0 : index
    %1 = vector.load %arg2[%c0_1, %c0_2] : memref<32x128xf32, #tpu.memory_space<vmem>>, vector<32x128xf32>
    %cst = arith.constant dense<0.000000e+00> : vector<32x128xf32>
    %2 = tpu.matmul %0, %1, %cst {dimension_numbers = #tpu.dot_dimension_numbers<[1], [0], [0], [1], [0, 0, 1, 1], [], []>} : vector<32x32xf32>, vector<32x128xf32>, vector<32x128xf32> -> vector<32x128xf32>
    %c0_3 = arith.constant 0 : index
    %c0_4 = arith.constant 0 : index
    %3 = vector.load %arg3[%c0_3, %c0_4] : memref<1x128xf32, #tpu.memory_space<vmem>>, vector<1x128xf32>
    %4 = vector.broadcast %3 : vector<1x128xf32> to vector<32x128xf32>
    %5 = arith.addf %2, %4 : vector<32x128xf32>
    %c0_5 = arith.constant 0 : index
    %c0_6 = arith.constant 0 : index
    %6 = vector.load %arg4[%c0_5, %c0_6] : memref<32x128xf32, #tpu.memory_space<vmem>>, vector<32x128xf32>
    tpu.vector_store %arg4[%c0_5, %c0_6], %5 {strides = array<i32>} : memref<32x128xf32, #tpu.memory_space<vmem>>, vector<32x128xf32>,
    return
  }
  func.func @transform_0(%arg0: i32) -> (i32, i32) {
    %c0_i32 = arith.constant 0 : i32
    %c0_i32_0 = arith.constant 0 : i32
    return %arg0, %c0_i32 : i32, i32
  }
  func.func @transform_1(%arg0: i32) -> (i32, i32) {
    %c0_i32 = arith.constant 0 : i32
    %c0_i32_0 = arith.constant 0 : i32
    %c0_i32_1 = arith.constant 0 : i32
    return %c0_i32, %c0_i32_0 : i32, i32
  }
  func.func @transform_2(%arg0: i32) -> (i32, i32) {
    %c0_i32 = arith.constant 0 : i32
    %c0_i32_0 = arith.constant 0 : i32
    %c0_i32_1 = arith.constant 0 : i32
    return %c0_i32, %c0_i32_0 : i32, i32
  }
  func.func @transform_3(%arg0: i32) -> (i32, i32) {
    %c0_i32 = arith.constant 0 : i32
    %c0_i32_0 = arith.constant 0 : i32
    return %arg0, %c0_i32 : i32, i32
  }
}

</mosaic_0001>

<bundles_post_ra>
// kernel: tpu_custom_call.1
= control target key start
LH: loop header
LB: loop body
LE: loop exit
PB: predicated region body
PF: predicated region fallthrough
CT: control target
= control target key end

     0   :  { %8 = vsyncpa [#allocation3], 0  ;;  %s330_s0 = inlined_call_operand.hbm [shape: f32[32,32], index: 0, kind: input, shape index: {}]   ;;  %s331_s1 = inlined_call_operand.hbm [shape: f32[32,128], index: 1, kind: input, shape index: {}]   ;;  %s332_s2 = inlined_call_operand.vmem [shape: f32[1,128], index: 2, kind: input, shape index: {}]   ;;  %s333_s3 = inlined_call_operand.hbm [shape: f32[32,128], index: 3, kind: output, shape index: {}]  }
   0x1   :  { %9 = vsyncpa [#allocation6], 0 }
   0x2   :  { %10 = vsyncpa [#allocation4], 0  ;;  %s284_s12 = smov [#allocation2]  }
   0x3   :  { %s16_s13 = sshll.u32 %s284_s12, 4  ;;  %s17_s13 = int_to_ptr.vmem [resolvable:$true] %s16_s13 }
   0x4   :  { %s226_s14 = scalar_lea.vmem %s17_s13, 512  ;;  %p231_p1 = scmp.lt.s32.totalorder %s17_s13, %s17_s13 }
   0x5   :  { %p227_p0 = scmp.ne.s32.totalorder %s17_s13, %s226_s14  ;;  %p232_p2 = scmp.lt.s32.totalorder %s226_s14, %s226_s14 }
   0x7   :  { %p233_p3 = por %p232_p2, %p231_p1 }
   0x9   :  { %p234_p4 = pnand %p233_p3, %p227_p0 }
   0xb   :  { %237 = shalt.err (!%p234_p4)
}
   0xc   :  { %s285_s15 = smov 128   ;;  %s286_s16 = smov 8  }
   0xd   :  { %22 = dma.hbm_to_vmem [thread:$0]  %s330_s0, 512, %s17_s13, [#allocation3], %s285_s15, %s285_s15, %s286_s16  }
   0xe   :  { %s287_s19 = smov [#allocation5]  }
   0xf   :  { %s28_s20 = sshll.u32 %s287_s19, 4  ;;  %s29_s20 = int_to_ptr.vmem [resolvable:$true] %s28_s20 }
  0x10   :  { %s246_s21 = scalar_lea.vmem %s29_s20, 512  ;;  %p251_p6 = scmp.lt.s32.totalorder %s29_s20, %s29_s20 }
  0x11   :  { %p247_p5 = scmp.ne.s32.totalorder %s29_s20, %s246_s21  ;;  %p252_p7 = scmp.lt.s32.totalorder %s246_s21, %s246_s21 }
  0x13   :  { %p253_p8 = por %p252_p7, %p251_p6 }
  0x15   :  { %p254_p9 = pnand %p253_p8, %p247_p5 }
  0x17   :  { %257 = shalt.err (!%p254_p9)
}
  0x18   :  { %34 = dma.hbm_to_vmem [thread:$0]  %s331_s1, 512, %s29_s20, [#allocation6], %s285_s15, %s285_s15, %s286_s16  }
  0x19   :  { %278 = dma.done.wait [#allocation3], 512  }
  0x1a   :  { %279 = vsyncadd [#allocation3], 4294966784 }
  0x1b   :  { %280 = dma.done.wait [#allocation6], 512  }
  0x1c   :  { %281 = vsyncadd [#allocation6], 4294966784  ;;  %v50_v0 = vld [vmem:[#allocation5 + $0x18] sm:$0xff]  ;;  %v49_v1 = vld [vmem:[#allocation5 + $0x10] sm:$0xff]  ;;  %vm58_vm0 = vcmask 261120   ;;  %s288_s24 = smov [#allocation7]  }
  0x1d   :  { %191 = vmatprep.subr.mxu0 %v50_v0  ;;  %205 = vmatprep.subr.mxu1 %v50_v0  ;;  %v48_v2 = vld [vmem:[#allocation5 + $0x8] sm:$0xff]  ;;  %v47_v3 = vld [vmem:[#allocation5] sm:$0xff]  ;;  %v45_v5 = vld [vmem:[#allocation2 + $0x10] sm:$0xff]  ;;  %s165_s25 = sshll.u32 %s288_s24, 4  ;;  %s166_s25 = int_to_ptr.vmem [resolvable:$true] %s165_s25 }
  0x1e   :  { %192 = vmatpush3.msra.mxu0 %v50_v0  ;;  %209 = vmatpush3.msra.mxu1 %v50_v0  ;;  %v43_v4 = vld [vmem:[#allocation2] sm:$0xff]  ;;  %v44_v6 = vld [vmem:[#allocation2 + $0x8] sm:$0xff]  ;;  %v46_v7 = vld [vmem:[#allocation2 + $0x18] sm:$0xff]  ;;  %s258_s26 = scalar_lea.vmem %s166_s25, 512  ;;  %p263_p11 = scmp.lt.s32.totalorder %s166_s25, %s166_s25 }
  0x1f   :  { %193 = vmatprep.subr.mxu0 %v49_v1  ;;  %206 = vmatprep.subr.mxu1 %v49_v1  ;;  %v178_v8 = vld [vmem:[%s332_s2] ss:$0 sm:$0xff]  ;;  %p259_p10 = scmp.ne.s32.totalorder %s166_s25, %s258_s26  ;;  %p264_p12 = scmp.lt.s32.totalorder %s258_s26, %s258_s26 }
  0x20   :  { %194 = vmatpush3.msra.mxu0 %v49_v1  ;;  %210 = vmatpush3.msra.mxu1 %v49_v1 }
  0x21   :  { %195 = vmatprep.subr.mxu0 %v48_v2  ;;  %207 = vmatprep.subr.mxu1 %v48_v2  ;;  %p265_p13 = por %p264_p12, %p263_p11 }
  0x22   :  { %196 = vmatpush3.msra.mxu0 %v48_v2  ;;  %211 = vmatpush3.msra.mxu1 %v48_v2 }
  0x23   :  { %197 = vmatprep.subr.mxu0 %v47_v3  ;;  %208 = vmatprep.subr.mxu1 %v47_v3  ;;  %p266_p0 = pnand %p265_p13, %p259_p10 }
  0x24   :  { %198 = vmatpush3.msra.mxu0 %v47_v3  ;;  %212 = vmatpush3.msra.mxu1 %v47_v3 }
  0x25   :  { %199 = vmatprep.mubr.msk.f32.mxu0 %vm58_vm0, %v43_v4  ;;  %202 = vmatprep.mubr.msk.f32.mxu1 %vm58_vm0, %v45_v5 }
  0x26   :  { %200 = vmatmul.mubr.msk.f32.vlgmr.msra.gmra.mxu0 %vm58_vm0, %v44_v6  ;;  %203 = vmatmul.mubr.msk.f32.vlgmr.msra.gmra.mxu1 %vm58_vm0, %v46_v7 }
  0xe6   :  { %v201_v9 = vpop.f32.mrf.mxu0  ;;  %v204_v10 = vpop.f32.mrf.mxu1 }
  0xe7   :  { %v143_v11 = vadd.f32 %v201_v9, %v178_v8  ;;  %v153_v12 = vadd.f32 %v204_v10, %v178_v8 }
  0xe8   :  { %v137_v13 = vpop.f32.mrf.mxu0  ;;  %v147_v14 = vpop.f32.mrf.mxu1 }
  0xe9   :  { %157 = vst [vmem:[#allocation7 + $0x8] sm:$0xff] %v143_v11  ;;  %159 = vst [vmem:[#allocation7 + $0x18] sm:$0xff] %v153_v12  ;;  %v138_v15 = vadd.f32 %v178_v8, %v137_v13  ;;  %v148_v16 = vadd.f32 %v178_v8, %v147_v14 }
  0xeb   :  { %156 = vst [vmem:[#allocation7] sm:$0xff] %v138_v15  ;;  %158 = vst [vmem:[#allocation7 + $0x10] sm:$0xff] %v148_v16 }
  0xec   :  { %269 = shalt.err (!%p266_p0)
}
  0xed   :  { %171 = dma.vmem_to_hbm [thread:$0]  %s166_s25, 512, %s333_s3, [#allocation4], %s285_s15, %s285_s15, %s286_s16  }
  0xee   :  { %282 = dma.done.wait [#allocation4], 512  }
  0xef   :  { %283 = vsyncadd [#allocation4], 4294966784 }
  0xf0   :  { %175 = vsyncpa [#allocation3], 1 }
  0xf1   :  { %176 = vsyncpa [#allocation6], 1 }
  0xf2   :  { %177 = vsyncpa [#allocation4], 1 }

</bundles_post_ra>
